<compile_context>
chip_gen: v7x
topology: tpu7x:2x2x1
jax: 0.10.0
libtpu: 0.0.40
codegen_flags: <defaults>
</compile_context>

<pallas_src>
import functools
import math

import jax
import jax.numpy as jnp
from jax.experimental import pallas as pl
from jax.experimental.pallas import tpu as pltpu


def _round_up(n, m):
    return ((n + m - 1) // m) * m


def _mlp_kernel(*refs, negative_slope, n_layers, matmul_dtype):
    # refs = (x_ref, w_0, b_0, w_1, b_1, ..., w_{L-1}, b_{L-1}, o_ref)
    x_ref = refs[0]
    o_ref = refs[1 + 2 * n_layers]

    h = x_ref[...]                                 # [tb, F0_pad] f32, on-chip
    for i in range(n_layers):
        w = refs[1 + 2 * i][...]                   # [Fi_pad, Fi+1_pad] bf16/f32
        b = refs[2 + 2 * i][...]                   # [1,  Fi+1_pad] f32
        # bf16 x bf16 -> f32 accumulation on the MXU; bias + activation in f32.
        y = jnp.dot(h.astype(matmul_dtype), w,
                    preferred_element_type=jnp.float32) + b
        if i < n_layers - 1:
            # LeakyReLU(slope) == max(y, slope*y) for 0 <= slope <= 1.
            y = jnp.maximum(y, negative_slope * y)
        h = y
    o_ref[...] = h.astype(o_ref.dtype)


def mlp_forward(x, padded_params, dim_out, negative_slope, *,
                matmul_dtype=jnp.bfloat16, batch_tile=256):
    """Fused multi-layer MLP forward on TPU via one pallas_call.

    `padded_params` holds weights [Fin_pad, Fout_pad] (bf16 or f32) and f32
    biases [1, Fout_pad], zero-padded to lane-aligned (128) feature widths at
    init.  Zero padding is exact: padded activation columns stay 0 through
    bias-add/LeakyReLU and hit zero weight rows in the next layer.
    """
    B, f_in = x.shape
    n_layers = len(padded_params)
    f0_pad = padded_params[0][0].shape[0]
    fl_pad = padded_params[-1][0].shape[1]
    widths_pad = [f0_pad] + [w.shape[1] for w, _ in padded_params]

    # ---- Batch tiling ----------------------------------------------------
    # 16-row alignment so bf16 intermediates pack cleanly (8 suffices for f32).
    row_align = 16 if matmul_dtype == jnp.bfloat16 else 8
    n_tiles = max(1, math.ceil(B / batch_tile))
    # Guarantee >= 2 tiles when the batch allows it so the "parallel" grid
    # axis actually shards across both TensorCores on v7x (a single extra
    # grid step, ~0.35us, on single-TC v5e/v6e).
    if n_tiles < 2 and B >= 2 * row_align:
        n_tiles = 2
    # Balance the tile size against B so batch-padding waste stays bounded.
    tb = _round_up(math.ceil(B / n_tiles), row_align)
    b_pad = _round_up(B, tb)
    grid = (b_pad // tb,)

    # ---- Input padding (only when actually needed) -------------------------
    if b_pad == B and f0_pad == f_in:
        x_in = x
    else:
        x_in = jnp.pad(x, ((0, b_pad - B), (0, f0_pad - f_in)))

    # ---- Specs -------------------------------------------------------------
    flat_params = []
    in_specs = [pl.BlockSpec((tb, f0_pad), lambda i: (i, 0))]
    for w_p, b_p in padded_params:
        flat_params += [w_p, b_p]
        # Constant index_map -> identical block for every batch tile: loaded
        # once, VMEM-resident across the whole grid; Buffered(1) drops the
        # useless second pipeline buffer for these never-changing blocks.
        in_specs.append(pl.BlockSpec(w_p.shape, lambda i: (0, 0),
                                     pipeline_mode=pl.Buffered(1)))
        in_specs.append(pl.BlockSpec(b_p.shape, lambda i: (0, 0),
                                     pipeline_mode=pl.Buffered(1)))
    out_spec = pl.BlockSpec((tb, fl_pad), lambda i: (i, 0))
    # TODO(synk): if any per-layer padded weight exceeds ~8-12 MiB bf16 on v7x
    # (64 MiB VMEM/TC; ~2x that threshold on v5e/v6e), add a K/N reduction
    # grid axis ("arbitrary") with a VMEM f32 accumulator + pl.when
    # init/finalize instead of keeping all weights resident.  Not needed at
    # these sizes.

    # ---- VMEM budget / cost estimate ---------------------------------------
    param_bytes = sum(w.size * w.dtype.itemsize + b.size * b.dtype.itemsize
                      for w, b in padded_params)
    io_tile_bytes = 2 * tb * f0_pad * 4 + 2 * tb * fl_pad * 4   # dbl-buffered x / out
    act_bytes = 4 * tb * max(widths_pad) * 4                    # live intermediates
    vmem_limit = int(1.5 * (param_bytes + io_tile_bytes + act_bytes)) + (1 << 20)
    vmem_limit = min(max(vmem_limit, 8 * 1024 * 1024), 100 * 1024 * 1024)

    flops = 2 * sum(b_pad * fi * fo
                    for fi, fo in zip(widths_pad[:-1], widths_pad[1:]))
    bytes_accessed = b_pad * f0_pad * 4 + b_pad * fl_pad * 4 + param_bytes
    cost = pl.CostEstimate(flops=flops, transcendentals=0,
                           bytes_accessed=bytes_accessed)

    kernel = functools.partial(_mlp_kernel, negative_slope=negative_slope,
                               n_layers=n_layers, matmul_dtype=matmul_dtype)
    out_pad = pl.pallas_call(
        kernel,
        out_shape=jax.ShapeDtypeStruct((b_pad, fl_pad), x.dtype),
        grid=grid,
        in_specs=in_specs,
        out_specs=out_spec,
        compiler_params=pltpu.CompilerParams(
            dimension_semantics=("parallel",),
            vmem_limit_bytes=vmem_limit,
        ),
        cost_estimate=cost,
    )(x_in, *flat_params)

    return out_pad[:B, :dim_out]


class DeterministicFFNN:
    """JAX/Pallas port of DeterministicFeedForwardNeuralNetwork."""

    def __init__(self, dim_in, dim_out, hid_layers, key,
                 use_batchnorm=False, negative_slope=0.01, dropout_rate=0,
                 use_bf16=True, batch_tile=256):
        # TODO(synk): BatchNorm1d (training-mode batch statistics) not implemented.
        assert not use_batchnorm
        # Dropout with p=0 is identity; nonzero rate would need in-kernel RNG.
        assert dropout_rate == 0
        assert 0.0 <= negative_slope <= 1.0  # required by the max() LeakyReLU form
        self.negative_slope = float(negative_slope)
        self.dim_out = dim_out
        self.batch_tile = batch_tile
        self.matmul_dtype = jnp.bfloat16 if use_bf16 else jnp.float32
        self.nn_layers = [dim_in] + list(hid_layers) + [dim_out]

        # Deterministic init mimicking nn.Linear's U(-1/sqrt(fan_in), 1/sqrt(fan_in)).
        # Weights stored as [in_features, out_features] so each layer is x @ W + b.
        self.params = []
        for idx in range(len(self.nn_layers) - 1):
            fan_in = self.nn_layers[idx]
            fan_out = self.nn_layers[idx + 1]
            key, kw, kb = jax.random.split(key, 3)
            bound = 1.0 / math.sqrt(fan_in)
            w = jax.random.uniform(kw, (fan_in, fan_out), jnp.float32,
                                   minval=-bound, maxval=bound)
            b = jax.random.uniform(kb, (fan_out,), jnp.float32,
                                   minval=-bound, maxval=bound)
            self.params.append((w, b))

        # Zero-pad all feature dims to lane multiples (128) ONCE, at init.
        # Weights stored directly in the matmul dtype (bf16 by default) so HBM
        # DMA bytes and resident VMEM are halved; biases stay f32 because the
        # bias add + LeakyReLU run on the f32 MXU accumulator output.
        padded_widths = [_round_up(f, 128) for f in self.nn_layers]
        self.padded_params = []
        for (w, b), fi_pad, fo_pad in zip(
                self.params, padded_widths[:-1], padded_widths[1:]):
            w_p = jnp.zeros((fi_pad, fo_pad), self.matmul_dtype)
            w_p = w_p.at[:w.shape[0], :w.shape[1]].set(
                w.astype(self.matmul_dtype))
            b_p = jnp.zeros((1, fo_pad), jnp.float32)
            b_p = b_p.at[0, :b.shape[0]].set(b)
            self.padded_params.append((w_p, b_p))

    def __call__(self, x):
        return mlp_forward(x, self.padded_params, self.dim_out,
                           self.negative_slope,
                           matmul_dtype=self.matmul_dtype,
                           batch_tile=self.batch_tile)


def _reference_forward(x, params, negative_slope):
    # Pure-JAX f32 reference for correctness checking (unpadded params).
    n = len(params)
    for i, (w, b) in enumerate(params):
        x = x @ w + b
        if i < n - 1:
            x = jnp.where(x >= 0, x, negative_slope * x)
    return x


if __name__ == "__main__":
    key = jax.random.PRNGKey(0)
    k_model, k_x = jax.random.split(key)

    batch = 8
    dim_in = 16
    hid_layers = [32, 32]
    dim_out = 8

    x = jax.random.normal(k_x, (batch, dim_in), jnp.float32)
    ref = _reference_forward(x, DeterministicFFNN(
        dim_in, dim_out, hid_layers, k_model).params, 0.01)

    # Default fast path: bf16 matmul operands, f32 accumulation.
    model = DeterministicFFNN(dim_in, dim_out, hid_layers, k_model)
    out = jax.block_until_ready(model(x))
    assert out.shape == (batch, dim_out)
    assert jnp.allclose(out, ref, atol=3e-2, rtol=3e-2), \
        float(jnp.max(jnp.abs(out - ref)))

    # Exact-parity f32 path.
    model_f32 = DeterministicFFNN(dim_in, dim_out, hid_layers, k_model,
                                  use_bf16=False)
    out_f32 = jax.block_until_ready(model_f32(x))
    assert jnp.allclose(out_f32, ref, atol=1e-5, rtol=1e-5), \
        float(jnp.max(jnp.abs(out_f32 - ref)))

    print("KERNEL_OK")
</pallas_src>

<mosaic_0001>
module attributes {stable_mosaic.version = 11 : i64} {
  func.func @_mlp_kernel(%arg0: i32, %arg1: memref<16x128xf32, #tpu.memory_space<vmem>>, %arg2: memref<128x128xbf16, #tpu.memory_space<vmem>>, %arg3: memref<1x128xf32, #tpu.memory_space<vmem>>, %arg4: memref<128x128xbf16, #tpu.memory_space<vmem>>, %arg5: memref<1x128xf32, #tpu.memory_space<vmem>>, %arg6: memref<128x128xbf16, #tpu.memory_space<vmem>>, %arg7: memref<1x128xf32, #tpu.memory_space<vmem>>, %arg8: memref<16x128xf32, #tpu.memory_space<vmem>>) attributes {dimension_semantics = [#tpu.dimension_semantics<parallel>], iteration_bounds = array<i64: 1>, scalar_prefetch = 0 : i64, scratch_operands = 0 : i64, tpu.core_type = #tpu.core_type<tc>, window_params = [{transform_indices = @transform_0, window_bounds = array<i64: 16, 128>}, {pipeline_mode = #tpu.pipeline_mode<synchronous>, transform_indices = @transform_1, window_bounds = array<i64: 128, 128>}, {pipeline_mode = #tpu.pipeline_mode<synchronous>, transform_indices = @transform_2, window_bounds = array<i64: 1, 128>}, {pipeline_mode = #tpu.pipeline_mode<synchronous>, transform_indices = @transform_3, window_bounds = array<i64: 128, 128>}, {pipeline_mode = #tpu.pipeline_mode<synchronous>, transform_indices = @transform_4, window_bounds = array<i64: 1, 128>}, {pipeline_mode = #tpu.pipeline_mode<synchronous>, transform_indices = @transform_5, window_bounds = array<i64: 128, 128>}, {pipeline_mode = #tpu.pipeline_mode<synchronous>, transform_indices = @transform_6, window_bounds = array<i64: 1, 128>}, {transform_indices = @transform_7, window_bounds = array<i64: 16, 128>}]} {
    %c0 = arith.constant 0 : index
    %c0_0 = arith.constant 0 : index
    %0 = vector.load %arg1[%c0, %c0_0] : memref<16x128xf32, #tpu.memory_space<vmem>>, vector<16x128xf32>
    %c0_1 = arith.constant 0 : index
    %c0_2 = arith.constant 0 : index
    %1 = vector.load %arg2[%c0_1, %c0_2] : memref<128x128xbf16, #tpu.memory_space<vmem>>, vector<128x128xbf16>
    %c0_3 = arith.constant 0 : index
    %c0_4 = arith.constant 0 : index
    %2 = vector.load %arg3[%c0_3, %c0_4] : memref<1x128xf32, #tpu.memory_space<vmem>>, vector<1x128xf32>
    %3 = arith.truncf %0 : vector<16x128xf32> to vector<16x128xbf16>
    %cst = arith.constant dense<0.000000e+00> : vector<16x128xf32>
    %4 = tpu.matmul %3, %1, %cst {dimension_numbers = #tpu.dot_dimension_numbers<[1], [0], [0], [1], [0, 0, 1, 1], [], []>} : vector<16x128xbf16>, vector<128x128xbf16>, vector<16x128xf32> -> vector<16x128xf32>
    %5 = vector.broadcast %2 : vector<1x128xf32> to vector<16x128xf32>
    %6 = arith.addf %4, %5 : vector<16x128xf32>
    %cst_5 = arith.constant 0.00999999977 : f32
    %7 = vector.broadcast %cst_5 : f32 to vector<16x128xf32>
    %8 = arith.mulf %7, %6 : vector<16x128xf32>
    %9 = arith.maximumf %6, %8 : vector<16x128xf32>
    %c0_6 = arith.constant 0 : index
    %c0_7 = arith.constant 0 : index
    %10 = vector.load %arg4[%c0_6, %c0_7] : memref<128x128xbf16, #tpu.memory_space<vmem>>, vector<128x128xbf16>
    %c0_8 = arith.constant 0 : index
    %c0_9 = arith.constant 0 : index
    %11 = vector.load %arg5[%c0_8, %c0_9] : memref<1x128xf32, #tpu.memory_space<vmem>>, vector<1x128xf32>
    %12 = arith.truncf %9 : vector<16x128xf32> to vector<16x128xbf16>
    %cst_10 = arith.constant dense<0.000000e+00> : vector<16x128xf32>
    %13 = tpu.matmul %12, %10, %cst_10 {dimension_numbers = #tpu.dot_dimension_numbers<[1], [0], [0], [1], [0, 0, 1, 1], [], []>} : vector<16x128xbf16>, vector<128x128xbf16>, vector<16x128xf32> -> vector<16x128xf32>
    %14 = vector.broadcast %11 : vector<1x128xf32> to vector<16x128xf32>
    %15 = arith.addf %13, %14 : vector<16x128xf32>
    %cst_11 = arith.constant 0.00999999977 : f32
    %16 = vector.broadcast %cst_11 : f32 to vector<16x128xf32>
    %17 = arith.mulf %16, %15 : vector<16x128xf32>
    %18 = arith.maximumf %15, %17 : vector<16x128xf32>
    %c0_12 = arith.constant 0 : index
    %c0_13 = arith.constant 0 : index
    %19 = vector.load %arg6[%c0_12, %c0_13] : memref<128x128xbf16, #tpu.memory_space<vmem>>, vector<128x128xbf16>
    %c0_14 = arith.constant 0 : index
    %c0_15 = arith.constant 0 : index
    %20 = vector.load %arg7[%c0_14, %c0_15] : memref<1x128xf32, #tpu.memory_space<vmem>>, vector<1x128xf32>
    %21 = arith.truncf %18 : vector<16x128xf32> to vector<16x128xbf16>
    %cst_16 = arith.constant dense<0.000000e+00> : vector<16x128xf32>
    %22 = tpu.matmul %21, %19, %cst_16 {dimension_numbers = #tpu.dot_dimension_numbers<[1], [0], [0], [1], [0, 0, 1, 1], [], []>} : vector<16x128xbf16>, vector<128x128xbf16>, vector<16x128xf32> -> vector<16x128xf32>
    %23 = vector.broadcast %20 : vector<1x128xf32> to vector<16x128xf32>
    %24 = arith.addf %22, %23 : vector<16x128xf32>
    %c0_17 = arith.constant 0 : index
    %c0_18 = arith.constant 0 : index
    %25 = vector.load %arg8[%c0_17, %c0_18] : memref<16x128xf32, #tpu.memory_space<vmem>>, vector<16x128xf32>
    tpu.vector_store %arg8[%c0_17, %c0_18], %24 {strides = array<i32>} : memref<16x128xf32, #tpu.memory_space<vmem>>, vector<16x128xf32>,
    return
  }
  func.func @transform_0(%arg0: i32) -> (i32, i32) {
    %c0_i32 = arith.constant 0 : i32
    %c0_i32_0 = arith.constant 0 : i32
    return %arg0, %c0_i32 : i32, i32
  }
  func.func @transform_1(%arg0: i32) -> (i32, i32) {
    %c0_i32 = arith.constant 0 : i32
    %c0_i32_0 = arith.constant 0 : i32
    %c0_i32_1 = arith.constant 0 : i32
    return %c0_i32, %c0_i32_0 : i32, i32
  }
  func.func @transform_2(%arg0: i32) -> (i32, i32) {
    %c0_i32 = arith.constant 0 : i32
    %c0_i32_0 = arith.constant 0 : i32
    %c0_i32_1 = arith.constant 0 : i32
    return %c0_i32, %c0_i32_0 : i32, i32
  }
  func.func @transform_3(%arg0: i32) -> (i32, i32) {
    %c0_i32 = arith.constant 0 : i32
    %c0_i32_0 = arith.constant 0 : i32
    %c0_i32_1 = arith.constant 0 : i32
    return %c0_i32, %c0_i32_0 : i32, i32
  }
  func.func @transform_4(%arg0: i32) -> (i32, i32) {
    %c0_i32 = arith.constant 0 : i32
    %c0_i32_0 = arith.constant 0 : i32
    %c0_i32_1 = arith.constant 0 : i32
    return %c0_i32, %c0_i32_0 : i32, i32
  }
  func.func @transform_5(%arg0: i32) -> (i32, i32) {
    %c0_i32 = arith.constant 0 : i32
    %c0_i32_0 = arith.constant 0 : i32
    %c0_i32_1 = arith.constant 0 : i32
    return %c0_i32, %c0_i32_0 : i32, i32
  }
  func.func @transform_6(%arg0: i32) -> (i32, i32) {
    %c0_i32 = arith.constant 0 : i32
    %c0_i32_0 = arith.constant 0 : i32
    %c0_i32_1 = arith.constant 0 : i32
    return %c0_i32, %c0_i32_0 : i32, i32
  }
  func.func @transform_7(%arg0: i32) -> (i32, i32) {
    %c0_i32 = arith.constant 0 : i32
    %c0_i32_0 = arith.constant 0 : i32
    return %arg0, %c0_i32 : i32, i32
  }
}

</mosaic_0001>

<bundles_post_ra>
// kernel: tpu_custom_call.1
= control target key start
LH: loop header
LB: loop body
LE: loop exit
PB: predicated region body
PF: predicated region fallthrough
CT: control target
= control target key end

     0   :  { %12 = vsyncpa [#allocation3], 0  ;;  %s892_s0 = inlined_call_operand.hbm [shape: f32[16,128], index: 0, kind: input, shape index: {}]   ;;  %s893_s1 = inlined_call_operand.hbm [shape: bf16[128,128], index: 1, kind: input, shape index: {}]   ;;  %s894_s2 = inlined_call_operand.vmem [shape: f32[1,128], index: 2, kind: input, shape index: {}]   ;;  %s895_s3 = inlined_call_operand.hbm [shape: bf16[128,128], index: 3, kind: input, shape index: {}]   ;;  %s896_s4 = inlined_call_operand.vmem [shape: f32[1,128], index: 4, kind: input, shape index: {}]   ;;  %s897_s5 = inlined_call_operand.hbm [shape: bf16[128,128], index: 5, kind: input, shape index: {}]   ;;  %s898_s6 = inlined_call_operand.vmem [shape: f32[1,128], index: 6, kind: input, shape index: {}]   ;;  %s899_s7 = inlined_call_operand.hbm [shape: f32[16,128], index: 7, kind: output, shape index: {}]  }
   0x1   :  { %13 = vsyncpa [#allocation6], 0 }
   0x2   :  { %14 = vsyncpa [#allocation9], 0 }
   0x3   :  { %15 = vsyncpa [#allocation4], 0  ;;  %s720_s24 = smov [#allocation5]   ;;  %s602_s28 = scalar_lea.hbm %s893_s1, 1024 }
   0x4   :  { %s33_s25 = sshll.u32 %s720_s24, 4  ;;  %p603_p0 = scmp.ne.s32.totalorder %s893_s1, %s602_s28  ;;  %s34_s25 = int_to_ptr.vmem [resolvable:$true] %s33_s25 }
   0x5   :  { %p606_p1 = scmp.lt.u32.totalorder %s602_s28, %s893_s1 }
   0x7   :  { %p608_p2 = pnand %p606_p1, %p603_p0 }
   0x9   :  { %611 = shalt.err (!%p608_p2)
}
   0xa   :  { %s612_s10 = scalar_lea.vmem %s34_s25, 1024  ;;  %p617_p4 = scmp.lt.s32.totalorder %s34_s25, %s34_s25 }
   0xb   :  { %p613_p3 = scmp.ne.s32.totalorder %s34_s25, %s612_s10  ;;  %p618_p5 = scmp.lt.s32.totalorder %s612_s10, %s612_s10 }
   0xd   :  { %p619_p6 = por %p618_p5, %p617_p4 }
   0xf   :  { %p620_p7 = pnand %p619_p6, %p613_p3 }
  0x11   :  { %623 = shalt.err (!%p620_p7)
}
  0x12   :  { %s721_s11 = smov 64   ;;  %s722_s12 = smov 4  }
  0x13   :  { %39 = dma.hbm_to_vmem [thread:$0]  %s893_s1, 1024, %s34_s25, [#allocation6], %s721_s11, %s721_s11, %s722_s12  }
  0x14   :  { %s723_s15 = smov [#allocation2]   ;;  %s624_s19 = scalar_lea.hbm %s892_s0, 256 }
  0x15   :  { %s21_s16 = sshll.u32 %s723_s15, 4  ;;  %p625_p8 = scmp.ne.s32.totalorder %s892_s0, %s624_s19  ;;  %s22_s16 = int_to_ptr.vmem [resolvable:$true] %s21_s16 }
  0x16   :  { %p628_p9 = scmp.lt.u32.totalorder %s624_s19, %s892_s0 }
  0x18   :  { %p630_p10 = pnand %p628_p9, %p625_p8 }
  0x1a   :  { %633 = shalt.err (!%p630_p10)
}
  0x1b   :  { %s634_s24 = scalar_lea.vmem %s22_s16, 256  ;;  %p639_p12 = scmp.lt.s32.totalorder %s22_s16, %s22_s16 }
  0x1c   :  { %p635_p11 = scmp.ne.s32.totalorder %s22_s16, %s634_s24  ;;  %p640_p13 = scmp.lt.s32.totalorder %s634_s24, %s634_s24 }
  0x1e   :  { %p641_p0 = por %p640_p13, %p639_p12 }
  0x20   :  { %p642_p1 = pnand %p641_p0, %p635_p11 }
  0x22   :  { %645 = shalt.err (!%p642_p1)
}
  0x23   :  { %s724_s1 = smov 128   ;;  %s725_s25 = smov 8  }
  0x24   :  { %27 = dma.hbm_to_vmem [thread:$0]  %s892_s0, 256, %s22_s16, [#allocation3], %s724_s1, %s724_s1, %s725_s25  }
  0x25   :  { %s726_s28 = smov [#allocation7]   ;;  %s727_s30 = smov [#allocation8]  }
  0x26   :  { %s47_s29 = sshll.u32 %s726_s28, 4  ;;  %s61_s8 = sshll.u32 %s727_s30, 4  ;;  %s48_s29 = int_to_ptr.vmem [resolvable:$true] %s47_s29  ;;  %s801_s8 = int_to_ptr.vmem [resolvable:$true] %s61_s8 }
  0x27   :  { %s646_s13 = scalar_lea.hbm %s895_s3, 1024 }
  0x28   :  { %p647_p2 = scmp.ne.s32.totalorder %s895_s3, %s646_s13  ;;  %p650_p3 = scmp.lt.u32.totalorder %s646_s13, %s895_s3 }
  0x2a   :  { %p652_p4 = pnand %p650_p3, %p647_p2 }
  0x2c   :  { %655 = shalt.err (!%p652_p4)
}
  0x2d   :  { %s656_s0 = scalar_lea.vmem %s48_s29, 1024  ;;  %p661_p6 = scmp.lt.s32.totalorder %s48_s29, %s48_s29 }
  0x2e   :  { %p657_p5 = scmp.ne.s32.totalorder %s48_s29, %s656_s0  ;;  %p662_p7 = scmp.lt.s32.totalorder %s656_s0, %s656_s0 }
  0x30   :  { %p663_p8 = por %p662_p7, %p661_p6 }
  0x32   :  { %p664_p9 = pnand %p663_p8, %p657_p5 }
  0x34   :  { %667 = shalt.err (!%p664_p9)
}
  0x35   :  { %53 = dma.hbm_to_vmem [thread:$0]  %s895_s3, 1024, %s48_s29, [#allocation6], %s721_s11, %s721_s11, %s722_s12  }
  0x36   :  { %s668_s22 = scalar_lea.hbm %s897_s5, 1024 }
  0x37   :  { %p669_p10 = scmp.ne.s32.totalorder %s897_s5, %s668_s22  ;;  %p672_p11 = scmp.lt.u32.totalorder %s668_s22, %s897_s5 }
  0x39   :  { %p674_p12 = pnand %p672_p11, %p669_p10 }
  0x3b   :  { %677 = shalt.err (!%p674_p12)
}
  0x3c   :  { %s678_s28 = scalar_lea.vmem %s801_s8, 1024  ;;  %p683_p0 = scmp.lt.s32.totalorder %s801_s8, %s801_s8 }
  0x3d   :  { %p679_p13 = scmp.ne.s32.totalorder %s801_s8, %s678_s28  ;;  %p684_p1 = scmp.lt.s32.totalorder %s678_s28, %s678_s28 }
  0x3f   :  { %p685_p2 = por %p684_p1, %p683_p0 }
  0x41   :  { %p686_p3 = pnand %p685_p2, %p679_p13 }
  0x43   :  { %689 = shalt.err (!%p686_p3)
}
  0x44   :  { %67 = dma.hbm_to_vmem [thread:$0]  %s897_s5, 1024, %s801_s8, [#allocation9], %s721_s11, %s721_s11, %s722_s12  }
  0x45   :  { %712 = dma.done.wait [#allocation3], 256  }
  0x46   :  { %713 = vsyncadd [#allocation3], 4294967040 }
  0x47   :  { %714 = dma.done.wait [#allocation6], 2048  }
  0x48   :  { %715 = vsyncadd [#allocation6], 4294965248 }
  0x49   :  { %716 = dma.done.wait [#allocation9], 1024  }
  0x4a   :  { %717 = vsyncadd [#allocation9], 4294966272  ;;  %v728_v0 = vmov 0.0   ;;  %vm729_vm0 = vmmov 0   ;;  %v578_v1 = vld [vmem:[#allocation5] sm:$0xff]   ;;  %v579_v2 = vld [vmem:[#allocation5 + $0x8] sm:$0xff]  }
  0x4b   :  { %507 = vmatprep.subr.bf16.mxu0 %v728_v0  ;;  %523 = vmatprep.mubr.msk.bf16.mxu0 %vm729_vm0, %v728_v0  ;;  %v580_v3 = vld [vmem:[#allocation5 + $0x10] sm:$0xff]   ;;  %v586_v4 = vld [vmem:[#allocation7] sm:$0xff]   ;;  %v581_v5 = vld [vmem:[#allocation5 + $0x18] sm:$0xff]   ;;  %s730_s9 = smov [#allocation10]  }
  0x4c   :  { %527 = vmatprep.subr.bf16.mxu1 %v728_v0  ;;  %543 = vmatprep.mubr.msk.bf16.mxu1 %vm729_vm0, %v728_v0  ;;  %v587_v6 = vld [vmem:[#allocation7 + $0x8] sm:$0xff]   ;;  %v582_v7 = vld [vmem:[#allocation5 + $0x20] sm:$0xff]   ;;  %v588_v8 = vld [vmem:[#allocation7 + $0x10] sm:$0xff]   ;;  %s439_s10 = sshll.u32 %s730_s9, 4  ;;  %s440_s10 = int_to_ptr.vmem [resolvable:$true] %s439_s10 }
  0x4d   :  { %508 = vmatpush3.bf16.msra.mxu0 %v578_v1  ;;  %528 = vmatpush3.bf16.msra.mxu1 %v586_v4  ;;  %v583_v9 = vld [vmem:[#allocation5 + $0x28] sm:$0xff]   ;;  %v589_v10 = vld [vmem:[#allocation7 + $0x18] sm:$0xff]   ;;  %v584_v11 = vld [vmem:[#allocation5 + $0x30] sm:$0xff]   ;;  %p695_p5 = scmp.lt.s32.totalorder %s440_s10, %s440_s10 }
  0x4e   :  { %509 = vmatprep.subr.bf16.mxu0 %v728_v0  ;;  %529 = vmatprep.subr.bf16.mxu1 %v728_v0  ;;  %v590_v12 = vld [vmem:[#allocation7 + $0x20] sm:$0xff]   ;;  %v585_v13 = vld [vmem:[#allocation5 + $0x38] sm:$0xff]   ;;  %v83_v14 = vld [vmem:[#allocation2] sm:$0xff] }
  0x4f   :  { %v84_v15 = vld [vmem:[#allocation2 + $0x8] sm:$0xff]  ;;  %v591_v17 = vld [vmem:[#allocation7 + $0x28] sm:$0xff]   ;;  %v592_v18 = vld [vmem:[#allocation7 + $0x30] sm:$0xff]  }
  0x50   :  { %v102_v16 = vpack.c.bf16 %v84_v15, %v83_v14  ;;  %v593_v19 = vld [vmem:[#allocation7 + $0x38] sm:$0xff]   ;;  %v594_v20 = vld [vmem:[#allocation8] sm:$0xff]   ;;  %v595_v21 = vld [vmem:[#allocation8 + $0x8] sm:$0xff]  }
  0x51   :  { %510 = vmatpush3.bf16.msra.mxu0 %v579_v2  ;;  %530 = vmatpush3.bf16.msra.mxu1 %v587_v6  ;;  %v596_v22 = vld [vmem:[#allocation8 + $0x10] sm:$0xff]   ;;  %v597_v23 = vld [vmem:[#allocation8 + $0x18] sm:$0xff]   ;;  %v598_v24 = vld [vmem:[#allocation8 + $0x20] sm:$0xff]  }
  0x52   :  { %511 = vmatprep.subr.bf16.mxu0 %v728_v0  ;;  %531 = vmatprep.subr.bf16.mxu1 %v728_v0  ;;  %v453_v25 = vld [vmem:[%s894_s2] ss:$0 sm:$0xff]  ;;  %v599_v37 = vld [vmem:[#allocation8 + $0x28] sm:$0xff]   ;;  %v601_v39 = vld [vmem:[#allocation8 + $0x38] sm:$0xff]  }
  0x53   :  { %v600_v38 = vld [vmem:[#allocation8 + $0x30] sm:$0xff]  }
  0x54   :  { %v462_v40 = vld [vmem:[%s896_s4] ss:$0 sm:$0xff]  ;;  %s690_s4 = scalar_lea.vmem %s440_s10, 256 }
  0x55   :  { %512 = vmatpush3.bf16.msra.mxu0 %v580_v3  ;;  %532 = vmatpush3.bf16.msra.mxu1 %v588_v8  ;;  %v471_v52 = vld [vmem:[%s898_s6] ss:$0 sm:$0xff]  ;;  %p691_p4 = scmp.ne.s32.totalorder %s440_s10, %s690_s4  ;;  %p696_p6 = scmp.lt.s32.totalorder %s690_s4, %s690_s4 }
  0x56   :  { %513 = vmatprep.subr.bf16.mxu0 %v728_v0  ;;  %533 = vmatprep.subr.bf16.mxu1 %v728_v0 }
  0x57   :  { %p697_p7 = por %p696_p6, %p695_p5 }
  0x59   :  { %514 = vmatpush3.bf16.msra.mxu0 %v581_v5  ;;  %534 = vmatpush3.bf16.msra.mxu1 %v589_v10  ;;  %p698_p8 = pnand %p697_p7, %p691_p4 }
  0x5a   :  { %515 = vmatprep.subr.bf16.mxu0 %v728_v0  ;;  %535 = vmatprep.subr.bf16.mxu1 %v728_v0 }
  0x5d   :  { %516 = vmatpush3.bf16.msra.mxu0 %v582_v7  ;;  %536 = vmatpush3.bf16.msra.mxu1 %v590_v12 }
  0x5e   :  { %517 = vmatprep.subr.bf16.mxu0 %v728_v0  ;;  %537 = vmatprep.subr.bf16.mxu1 %v728_v0 }
  0x61   :  { %518 = vmatpush3.bf16.msra.mxu0 %v583_v9  ;;  %538 = vmatpush3.bf16.msra.mxu1 %v591_v17 }
  0x62   :  { %519 = vmatprep.subr.bf16.mxu0 %v728_v0  ;;  %539 = vmatprep.subr.bf16.mxu1 %v728_v0 }
  0x65   :  { %520 = vmatpush3.bf16.msra.mxu0 %v584_v11  ;;  %540 = vmatpush3.bf16.msra.mxu1 %v592_v18 }
  0x66   :  { %521 = vmatprep.subr.bf16.mxu0 %v728_v0  ;;  %541 = vmatprep.subr.bf16.mxu1 %v728_v0 }
  0x69   :  { %522 = vmatpush3.bf16.msra.mxu0 %v585_v13  ;;  %542 = vmatpush3.bf16.msra.mxu1 %v593_v19 }
  0x6a   :  { %547 = vmatprep.subr.bf16.mxu0 %v728_v0 }
  0x6c   :  { %524 = vmatmul.mubr.bf16.vlgmr.msra.gmra.mrb[0].mxu0 %v102_v16 }
  0x6d   :  { %563 = vmatprep.mubr.msk.bf16.mxu0 %vm729_vm0, %v728_v0  ;;  %548 = vmatpush3.bf16.msra.mxu0 %v594_v20 }
  0x6e   :  { %549 = vmatprep.subr.bf16.mxu0 %v728_v0 }
  0x71   :  { %550 = vmatpush3.bf16.msra.mxu0 %v595_v21 }
  0x72   :  { %551 = vmatprep.subr.bf16.mxu0 %v728_v0 }
  0x75   :  { %552 = vmatpush3.bf16.msra.mxu0 %v596_v22 }
  0x76   :  { %553 = vmatprep.subr.bf16.mxu0 %v728_v0 }
  0x79   :  { %554 = vmatpush3.bf16.msra.mxu0 %v597_v23 }
  0x7a   :  { %555 = vmatprep.subr.bf16.mxu0 %v728_v0 }
  0x7d   :  { %556 = vmatpush3.bf16.msra.mxu0 %v598_v24 }
  0x7e   :  { %557 = vmatprep.subr.bf16.mxu0 %v728_v0 }
  0x81   :  { %558 = vmatpush3.bf16.msra.mxu0 %v599_v37 }
  0x82   :  { %559 = vmatprep.subr.bf16.mxu0 %v728_v0 }
  0x85   :  { %560 = vmatpush3.bf16.msra.mxu0 %v600_v38 }
  0x86   :  { %561 = vmatprep.subr.bf16.mxu0 %v728_v0 }
  0x89   :  { %562 = vmatpush3.bf16.msra.mxu0 %v601_v39 }
 0x13f   :  { %v191_v26 = vpop.f32.mrb[0].mxu0 }
 0x140   :  { %v192_v27 = vadd.f32 %v453_v25, %v191_v26  ;;  %v525_v28 = vpop.f32.mrb[1].mxu0 }
 0x141   :  { %v194_v29 = vpop.f32.mrb[2].mxu0 }
 0x142   :  { %v198_v30 = vmul.f32 0.01, %v192_v27  ;;  %v195_v31 = vadd.f32 %v453_v25, %v194_v29  ;;  %v526_v32 = vpop.f32.mrb[3].mxu0 }
 0x144   :  { %v199_v33 = vmul.f32 0.01, %v195_v31  ;;  %v200_v34 = vmax.f32 %v192_v27, %v198_v30 }
 0x146   :  { %v201_v35 = vmax.f32 %v195_v31, %v199_v33 }
 0x148   :  { %v219_v36 = vpack.c.bf16 %v201_v35, %v200_v34 }
 0x14a   :  { %544 = vmatmul.mubr.bf16.vlgmr.msra.gmra.mrb[0].mxu1 %v219_v36 }
 0x21d   :  { %v308_v41 = vpop.f32.mrb[0].mxu1 }
 0x21e   :  { %v309_v42 = vadd.f32 %v462_v40, %v308_v41  ;;  %v545_v43 = vpop.f32.mrb[1].mxu1 }
 0x21f   :  { %v311_v44 = vpop.f32.mrb[2].mxu1 }
 0x220   :  { %v315_v45 = vmul.f32 0.01, %v309_v42  ;;  %v312_v46 = vadd.f32 %v462_v40, %v311_v44  ;;  %v546_v47 = vpop.f32.mrb[3].mxu1 }
 0x222   :  { %v316_v48 = vmul.f32 0.01, %v312_v46  ;;  %v317_v49 = vmax.f32 %v309_v42, %v315_v45 }
 0x224   :  { %v318_v50 = vmax.f32 %v312_v46, %v316_v48 }
 0x226   :  { %v336_v51 = vpack.c.bf16 %v318_v50, %v317_v49 }
 0x228   :  { %564 = vmatmul.mubr.bf16.vlgmr.msra.gmra.mrb[4].mxu0 %v336_v51 }
 0x2fb   :  { %v425_v53 = vpop.f32.mrb[4].mxu0 }
 0x2fc   :  { %v426_v54 = vadd.f32 %v471_v52, %v425_v53  ;;  %v565_v55 = vpop.f32.mrb[5].mxu0 }
 0x2fd   :  { %v428_v56 = vpop.f32.mrb[6].mxu0 }
 0x2fe   :  { %432 = vst [vmem:[#allocation10] sm:$0xff] %v426_v54  ;;  %v429_v57 = vadd.f32 %v471_v52, %v428_v56  ;;  %v566_v58 = vpop.f32.mrb[7].mxu0 }
 0x300   :  { %433 = vst [vmem:[#allocation10 + $0x8] sm:$0xff] %v429_v57 }
 0x301   :  { %701 = shalt.err (!%p698_p8)
}
 0x302   :  { %s702_s14 = scalar_lea.hbm %s899_s7, 256 }
 0x303   :  { %p703_p9 = scmp.ne.s32.totalorder %s899_s7, %s702_s14  ;;  %p706_p10 = scmp.lt.u32.totalorder %s702_s14, %s899_s7 }
 0x305   :  { %p708_p11 = pnand %p706_p10, %p703_p9 }
 0x307   :  { %711 = shalt.err (!%p708_p11)
}
 0x308   :  { %445 = dma.vmem_to_hbm [thread:$0]  %s440_s10, 256, %s899_s7, [#allocation4], %s724_s1, %s724_s1, %s725_s25  }
 0x309   :  { %718 = dma.done.wait [#allocation4], 256  }
 0x30a   :  { %719 = vsyncadd [#allocation4], 4294967040 }
 0x30b   :  { %449 = vsyncpa [#allocation3], 1 }
 0x30c   :  { %450 = vsyncpa [#allocation6], 1 }
 0x30d   :  { %451 = vsyncpa [#allocation9], 1 }
 0x30e   :  { %452 = vsyncpa [#allocation4], 1 }

</bundles_post_ra>
